<compile_context>
chip_gen: v5e
topology: v5e:2x2
jax: 0.10.0
libtpu: 0.0.40
codegen_flags: <defaults>
</compile_context>

<pallas_src>
import jax
import jax.numpy as jnp
from jax import lax
from jax.experimental import pallas as pl
from jax.experimental.pallas import tpu as pltpu

EPS = 1e-3

# Single fused-call path whenever x comfortably fits VMEM (in + out + one
# centered temp); conservative so it is safe on v7x's 64 MiB VMEM too.
_FUSE_LIMIT_BYTES = 4 << 20


# ------------------------- fused single-kernel path -------------------------
def _make_fused_kernel(n, hw, eps):
    inv_m = 1.0 / float(n * hw)

    def fused_kernel(x_ref, g_ref, bt_ref, o_ref):
        x = x_ref[...]                                     # (N, C, HW) in VMEM
        # Two-pass per-channel stats: data is already VMEM-resident so the
        # second pass costs no HBM traffic and avoids E[x^2]-mean^2 cancellation.
        s = jnp.sum(x, axis=2, keepdims=True)              # (N, C, 1) lane reduce
        mean = jnp.sum(s, axis=0, keepdims=True) * inv_m   # (1, C, 1)
        xc = x - mean
        v = jnp.sum(xc * xc, axis=2, keepdims=True)
        var = jnp.sum(v, axis=0, keepdims=True) * inv_m    # biased (training) var
        a = g_ref[...] * lax.rsqrt(var + eps)              # rsqrt -> EUP slot
        b = bt_ref[...] - mean * a
        o_ref[...] = jnp.maximum(x * a + b, 0.0)

    return fused_kernel


def _batchnorm_relu_fused(x, gamma, beta, eps):
    N, C, HW = x.shape
    g = gamma.reshape(1, C, 1).astype(jnp.float32)
    bt = beta.reshape(1, C, 1).astype(jnp.float32)
    return pl.pallas_call(
        _make_fused_kernel(N, HW, eps),
        out_shape=jax.ShapeDtypeStruct((N, C, HW), jnp.float32),
        grid=(1,),
        in_specs=[pl.BlockSpec((N, C, HW), lambda i: (0, 0, 0)),
                  pl.BlockSpec((1, C, 1), lambda i: (0, 0, 0)),
                  pl.BlockSpec((1, C, 1), lambda i: (0, 0, 0))],
        out_specs=pl.BlockSpec((N, C, HW), lambda i: (0, 0, 0)),
        compiler_params=pltpu.CompilerParams(
            dimension_semantics=("arbitrary",),
            vmem_limit_bytes=32 << 20),
    )(x, g, bt)


# --------------------------- tiled two-phase path ---------------------------
def _pick_hw_tile(hw, c_blk, itemsize=4, target_bytes=2 << 20):
    """~2 MiB lane-dense input blocks (multiple of 128 lanes when tiled)."""
    max_lanes = max(128, target_bytes // (c_blk * itemsize))
    if hw <= max_lanes:
        return hw                      # full spatial extent: always a legal block dim
    return (max_lanes // 128) * 128


def _make_stats_ab_kernel(hw, hw_tile, n_hw, needs_mask, total, eps):
    inv_m = 1.0 / float(total)

    def stats_ab_kernel(x_ref, g_ref, bt_ref, a_ref, b_ref, sum_ref, sq_ref):
        n = pl.program_id(1)
        m = pl.program_id(2)

        @pl.when(jnp.logical_and(n == 0, m == 0))
        def _init():
            sum_ref[...] = jnp.zeros_like(sum_ref)
            sq_ref[...] = jnp.zeros_like(sq_ref)

        x = x_ref[0]                                   # (c_blk, hw_tile)

        def _accum(xv):
            sum_ref[...] += jnp.sum(xv, axis=1, keepdims=True)
            sq_ref[...] += jnp.sum(xv * xv, axis=1, keepdims=True)

        if needs_mask:
            # Only the tail tile pays the iota/compare/select cost.
            @pl.when(m == n_hw - 1)
            def _tail():
                col = lax.broadcasted_iota(jnp.int32, x.shape, 1) + m * hw_tile
                _accum(jnp.where(col < hw, x, 0.0))

            @pl.when(m != n_hw - 1)
            def _body():
                _accum(x)
        else:
            _accum(x)

        # Epilogue: fold mean/var/gamma/beta into y = x*a + b and emit (c_blk,1)
        # a,b directly, avoiding tiny XLA ops between the two pallas_calls.
        @pl.when(jnp.logical_and(n == pl.num_programs(1) - 1,
                                 m == pl.num_programs(2) - 1))
        def _fin():
            mean = sum_ref[...] * inv_m
            # TODO(synk): single-pass E[x^2]-mean^2 loses precision when
            # |mean| >> std; clamped at 0 (two-pass used on the fused path).
            var = jnp.maximum(sq_ref[...] * inv_m - mean * mean, 0.0)
            a = g_ref[...] * lax.rsqrt(var + eps)
            a_ref[...] = a
            b_ref[...] = bt_ref[...] - mean * a

    return stats_ab_kernel


def _norm_relu_kernel(x_ref, a_ref, b_ref, o_ref):
    # a, b are (c_blk, 1) and stay VMEM-resident.  Any out-of-bounds tail lanes
    # flow through the FMA/max unmasked; Pallas drops OOB lanes of the final
    # block on writeback, so this is safe.
    o_ref[0] = jnp.maximum(x_ref[0] * a_ref[...] + b_ref[...], 0.0)


def batchnorm_relu(x_nchw, gamma, beta, eps=EPS, force_two_phase=False):
    """x_nchw: (N, C, H, W) float32; gamma, beta: (C,) float32."""
    N, C, H, W = x_nchw.shape
    HW = H * W
    x = x_nchw.reshape(N, C, HW).astype(jnp.float32)   # free reshape, no transpose

    if (not force_two_phase) and (x.size * 4 <= _FUSE_LIMIT_BYTES):
        return _batchnorm_relu_fused(x, gamma, beta, eps).reshape(N, C, H, W)

    # ---- large-activation fallback: two streaming passes over x ----
    c_blk = 64 if (C % 64 == 0 and C >= 128) else C    # megacore channel split
    n_c = C // c_blk
    hw_tile = _pick_hw_tile(HW, c_blk)
    n_hw = pl.cdiv(HW, hw_tile)
    needs_mask = (HW % hw_tile) != 0

    g = gamma.reshape(C, 1).astype(jnp.float32)
    bt = beta.reshape(C, 1).astype(jnp.float32)

    # phase 1: per-channel stats -> fused a, b   (one read of x)
    a, b = pl.pallas_call(
        _make_stats_ab_kernel(HW, hw_tile, n_hw, needs_mask, N * HW, eps),
        out_shape=(jax.ShapeDtypeStruct((C, 1), jnp.float32),
                   jax.ShapeDtypeStruct((C, 1), jnp.float32)),
        grid=(n_c, N, n_hw),
        in_specs=[pl.BlockSpec((1, c_blk, hw_tile), lambda c, n, m: (n, c, m)),
                  pl.BlockSpec((c_blk, 1), lambda c, n, m: (c, 0)),
                  pl.BlockSpec((c_blk, 1), lambda c, n, m: (c, 0))],
        out_specs=(pl.BlockSpec((c_blk, 1), lambda c, n, m: (c, 0)),
                   pl.BlockSpec((c_blk, 1), lambda c, n, m: (c, 0))),
        scratch_shapes=[pltpu.VMEM((c_blk, 1), jnp.float32),
                        pltpu.VMEM((c_blk, 1), jnp.float32)],
        compiler_params=pltpu.CompilerParams(
            dimension_semantics=("parallel", "arbitrary", "arbitrary")),
    )(x, g, bt)

    # phase 2: fused scale-bias + ReLU   (one read, one write of x)
    out = pl.pallas_call(
        _norm_relu_kernel,
        out_shape=jax.ShapeDtypeStruct((N, C, HW), jnp.float32),
        grid=(n_c, N, n_hw),
        in_specs=[pl.BlockSpec((1, c_blk, hw_tile), lambda c, n, m: (n, c, m)),
                  pl.BlockSpec((c_blk, 1), lambda c, n, m: (c, 0)),
                  pl.BlockSpec((c_blk, 1), lambda c, n, m: (c, 0))],
        out_specs=pl.BlockSpec((1, c_blk, hw_tile), lambda c, n, m: (n, c, m)),
        compiler_params=pltpu.CompilerParams(
            dimension_semantics=("parallel", "parallel", "parallel")),
    )(x, a, b)

    return out.reshape(N, C, H, W)


if __name__ == "__main__":
    key = jax.random.PRNGKey(0)
    kx, kg, kb = jax.random.split(key, 3)

    # Shape implied by the original module's input: (1, 128, 12, 12).
    N, C, H, W = 1, 128, 12, 12
    x = jax.random.normal(kx, (N, C, H, W), dtype=jnp.float32)
    gamma = 1.0 + 0.1 * jax.random.normal(kg, (C,), dtype=jnp.float32)
    beta = 0.1 * jax.random.normal(kb, (C,), dtype=jnp.float32)

    # Pure-JAX reference: training-mode BN (biased batch variance) + ReLU.
    mean = jnp.mean(x, axis=(0, 2, 3), keepdims=True)
    var = jnp.mean((x - mean) ** 2, axis=(0, 2, 3), keepdims=True)
    ref = (x - mean) * lax.rsqrt(var + EPS)
    ref = ref * gamma.reshape(1, C, 1, 1) + beta.reshape(1, C, 1, 1)
    ref = jnp.maximum(ref, 0.0)

    # Fast path: single fused kernel (the whole activation fits in VMEM).
    out = jax.block_until_ready(batchnorm_relu(x, gamma, beta))
    assert out.shape == (N, C, H, W)
    err = float(jnp.max(jnp.abs(out - ref)))
    assert err < 5e-4, ("fused", err)

    # Also exercise the tiled two-phase path used for large activations.
    out2 = jax.block_until_ready(batchnorm_relu(x, gamma, beta, force_two_phase=True))
    err2 = float(jnp.max(jnp.abs(out2 - ref)))
    assert err2 < 5e-4, ("two_phase", err2)

    print("KERNEL_OK")
</pallas_src>

<mosaic_0001>
module attributes {stable_mosaic.version = 11 : i64} {
  func.func @fused_kernel(%arg0: i32, %arg1: memref<1x128x144xf32, #tpu.memory_space<vmem>>, %arg2: memref<1x128x1xf32, #tpu.memory_space<vmem>>, %arg3: memref<1x128x1xf32, #tpu.memory_space<vmem>>, %arg4: memref<1x128x144xf32, #tpu.memory_space<vmem>>) attributes {dimension_semantics = [#tpu.dimension_semantics<arbitrary>], iteration_bounds = array<i64: 1>, scalar_prefetch = 0 : i64, scratch_operands = 0 : i64, tpu.core_type = #tpu.core_type<tc>, window_params = [{pipeline_mode = #tpu.pipeline_mode<synchronous>, transform_indices = @transform_0, window_bounds = array<i64: 1, 128, 144>}, {pipeline_mode = #tpu.pipeline_mode<synchronous>, transform_indices = @transform_1, window_bounds = array<i64: 1, 128, 1>}, {pipeline_mode = #tpu.pipeline_mode<synchronous>, transform_indices = @transform_2, window_bounds = array<i64: 1, 128, 1>}, {pipeline_mode = #tpu.pipeline_mode<synchronous>, transform_indices = @transform_3, window_bounds = array<i64: 1, 128, 144>}]} {
    %c0 = arith.constant 0 : index
    %c0_0 = arith.constant 0 : index
    %c0_1 = arith.constant 0 : index
    %0 = vector.load %arg1[%c0, %c0_0, %c0_1] : memref<1x128x144xf32, #tpu.memory_space<vmem>>, vector<1x128x144xf32>
    %cst = arith.constant dense<0.000000e+00> : vector<1x128xf32>
    %1 = vector.multi_reduction <add>, %0, %cst [2] : vector<1x128x144xf32> to vector<1x128xf32>
    %2 = vector.shape_cast %1 : vector<1x128xf32> to vector<1x128x1xf32>
    %cst_2 = arith.constant dense<0.000000e+00> : vector<128x1xf32>
    %3 = vector.multi_reduction <add>, %2, %cst_2 [0] : vector<1x128x1xf32> to vector<128x1xf32>
    %4 = vector.shape_cast %3 : vector<128x1xf32> to vector<1x128x1xf32>
    %cst_3 = arith.constant 0.0069444445 : f32
    %5 = vector.broadcast %cst_3 : f32 to vector<1x128x1xf32>
    %6 = arith.mulf %4, %5 : vector<1x128x1xf32>
    %7 = vector.broadcast %6 : vector<1x128x1xf32> to vector<1x128x144xf32>
    %8 = arith.subf %0, %7 : vector<1x128x144xf32>
    %9 = arith.mulf %8, %8 : vector<1x128x144xf32>
    %cst_4 = arith.constant dense<0.000000e+00> : vector<1x128xf32>
    %10 = vector.multi_reduction <add>, %9, %cst_4 [2] : vector<1x128x144xf32> to vector<1x128xf32>
    %11 = vector.shape_cast %10 : vector<1x128xf32> to vector<1x128x1xf32>
    %cst_5 = arith.constant dense<0.000000e+00> : vector<128x1xf32>
    %12 = vector.multi_reduction <add>, %11, %cst_5 [0] : vector<1x128x1xf32> to vector<128x1xf32>
    %13 = vector.shape_cast %12 : vector<128x1xf32> to vector<1x128x1xf32>
    %cst_6 = arith.constant 0.0069444445 : f32
    %14 = vector.broadcast %cst_6 : f32 to vector<1x128x1xf32>
    %15 = arith.mulf %13, %14 : vector<1x128x1xf32>
    %c0_7 = arith.constant 0 : index
    %c0_8 = arith.constant 0 : index
    %c0_9 = arith.constant 0 : index
    %16 = vector.load %arg2[%c0_7, %c0_8, %c0_9] : memref<1x128x1xf32, #tpu.memory_space<vmem>>, vector<1x128x1xf32>
    %cst_10 = arith.constant 1.000000e-03 : f32
    %17 = vector.broadcast %cst_10 : f32 to vector<1x128x1xf32>
    %18 = arith.addf %15, %17 : vector<1x128x1xf32>
    %19 = math.rsqrt %18 : vector<1x128x1xf32>
    %20 = arith.mulf %16, %19 : vector<1x128x1xf32>
    %c0_11 = arith.constant 0 : index
    %c0_12 = arith.constant 0 : index
    %c0_13 = arith.constant 0 : index
    %21 = vector.load %arg3[%c0_11, %c0_12, %c0_13] : memref<1x128x1xf32, #tpu.memory_space<vmem>>, vector<1x128x1xf32>
    %22 = arith.mulf %6, %20 : vector<1x128x1xf32>
    %23 = arith.subf %21, %22 : vector<1x128x1xf32>
    %24 = vector.broadcast %20 : vector<1x128x1xf32> to vector<1x128x144xf32>
    %25 = arith.mulf %0, %24 : vector<1x128x144xf32>
    %26 = vector.broadcast %23 : vector<1x128x1xf32> to vector<1x128x144xf32>
    %27 = arith.addf %25, %26 : vector<1x128x144xf32>
    %cst_14 = arith.constant 0.000000e+00 : f32
    %28 = vector.broadcast %cst_14 : f32 to vector<1x128x144xf32>
    %29 = arith.maximumf %27, %28 : vector<1x128x144xf32>
    %c0_15 = arith.constant 0 : index
    %c0_16 = arith.constant 0 : index
    %c0_17 = arith.constant 0 : index
    %30 = vector.load %arg4[%c0_15, %c0_16, %c0_17] : memref<1x128x144xf32, #tpu.memory_space<vmem>>, vector<1x128x144xf32>
    tpu.vector_store %arg4[%c0_15, %c0_16, %c0_17], %29 {strides = array<i32>} : memref<1x128x144xf32, #tpu.memory_space<vmem>>, vector<1x128x144xf32>,
    return
  }
  func.func @transform_0(%arg0: i32) -> (i32, i32, i32) {
    %c0_i32 = arith.constant 0 : i32
    %c0_i32_0 = arith.constant 0 : i32
    %c0_i32_1 = arith.constant 0 : i32
    %c0_i32_2 = arith.constant 0 : i32
    return %c0_i32, %c0_i32_0, %c0_i32_1 : i32, i32, i32
  }
  func.func @transform_1(%arg0: i32) -> (i32, i32, i32) {
    %c0_i32 = arith.constant 0 : i32
    %c0_i32_0 = arith.constant 0 : i32
    %c0_i32_1 = arith.constant 0 : i32
    %c0_i32_2 = arith.constant 0 : i32
    return %c0_i32, %c0_i32_0, %c0_i32_1 : i32, i32, i32
  }
  func.func @transform_2(%arg0: i32) -> (i32, i32, i32) {
    %c0_i32 = arith.constant 0 : i32
    %c0_i32_0 = arith.constant 0 : i32
    %c0_i32_1 = arith.constant 0 : i32
    %c0_i32_2 = arith.constant 0 : i32
    return %c0_i32, %c0_i32_0, %c0_i32_1 : i32, i32, i32
  }
  func.func @transform_3(%arg0: i32) -> (i32, i32, i32) {
    %c0_i32 = arith.constant 0 : i32
    %c0_i32_0 = arith.constant 0 : i32
    %c0_i32_1 = arith.constant 0 : i32
    %c0_i32_2 = arith.constant 0 : i32
    return %c0_i32, %c0_i32_0, %c0_i32_1 : i32, i32, i32
  }
}

</mosaic_0001>

<bundles_post_ra>
// kernel: tpu_custom_call.1
= control target key start
LH: loop header
LB: loop body
LE: loop exit
PB: predicated region body
PF: predicated region fallthrough
CT: control target
= control target key end

     0   :  { %vm46_vm0 = vcmask 130048   ;;  %s1902_s0 = inlined_call_operand.vmem [shape: f32[1,128,144], index: 0, kind: input, shape index: {}]   ;;  %s1903_s1 = inlined_call_operand.vmem [shape: f32[1,128,1], index: 1, kind: input, shape index: {}]   ;;  %s1904_s2 = inlined_call_operand.vmem [shape: f32[1,128,1], index: 2, kind: input, shape index: {}]   ;;  %s1905_s3 = inlined_call_operand.vmem [shape: f32[1,128,144], index: 3, kind: output, shape index: {}]  }
   0x1   :  { %v943_v0 = vld [vmem:[%s1902_s0 + $0x40] sm:$0xff]  ;;  %v948_v1 = vld [vmem:[%s1902_s0 + $0x48] sm:$0xff]  ;;  %v980_v10 = vld [vmem:[%s1902_s0 + $0x58] sm:$0xff] }
   0x2   :  { %v953_v2 = vld [vmem:[%s1902_s0 + $0x20] sm:$0xff]  ;;  %v63_v3 = vsel %vm46_vm0, %v948_v1, 0.0  ;;  %v960_v4 = vld [vmem:[%s1902_s0 + $0x28] sm:$0xff]  ;;  %v987_v13 = vld [vmem:[%s1902_s0 + $0x38] sm:$0xff]  ;;  %v67_v16 = vsel %vm46_vm0, %v980_v10, 0.0 }
   0x3   :  { %v965_v5 = vld [vmem:[%s1902_s0] sm:$0xff]  ;;  %v970_v6 = vld [vmem:[%s1902_s0 + $0x8] sm:$0xff]  ;;  %v64_v7 = vadd.f32 %v63_v3, %v943_v0  ;;  %v55_v8 = vsel %vm46_vm0, %v960_v4, 0.0  ;;  %v992_v14 = vld [vmem:[%s1902_s0 + $0x18] sm:$0xff]  ;;  %v59_v18 = vsel %vm46_vm0, %v987_v13, 0.0 }
   0x4   :  { %v47_v9 = vsel %vm46_vm0, %v970_v6, 0.0  ;;  %v56_v11 = vadd.f32 %v55_v8, %v953_v2  ;;  %v997_v15 = vld [vmem:[%s1902_s0 + $0x50] sm:$0xff]  ;;  %v51_v20 = vsel %vm46_vm0, %v992_v14, 0.0  ;;  %v1021_v24 = vld [vmem:[%s1902_s0 + $0x88] sm:$0xff]  ;;  %v1031_v26 = vld [vmem:[%s1902_s0 + $0x78] sm:$0xff] }
   0x5   :  { %v48_v12 = vadd.f32 %v47_v9, %v965_v5  ;;  %65 = vadd.xlane.f32.xlu2 %v64_v7  ;;  %v1004_v17 = vld [vmem:[%s1902_s0 + $0x30] sm:$0xff]  ;;  %v68_v21 = vadd.f32 %v67_v16, %v997_v15  ;;  %v1026_v25 = vld [vmem:[%s1902_s0 + $0x68] sm:$0xff]  ;;  %v1036_v27 = vld [vmem:[%s1902_s0 + $0x80] sm:$0xff]  ;;  %v79_v28 = vsel %vm46_vm0, %v1021_v24, 0.0  ;;  %v75_v32 = vsel %vm46_vm0, %v1031_v26, 0.0 }
   0x6   :  { %57 = vadd.xlane.f32.xlu1 %v56_v11  ;;  %v1011_v19 = vld [vmem:[%s1902_s0 + $0x10] sm:$0xff]  ;;  %v60_v22 = vadd.f32 %v59_v18, %v1004_v17  ;;  %v1043_v29 = vld [vmem:[%s1902_s0 + $0x60] sm:$0xff]  ;;  %v71_v30 = vsel %vm46_vm0, %v1026_v25, 0.0  ;;  %v80_v33 = vadd.f32 %v79_v28, %v1036_v27  ;;  %v1060_v36 = vld [vmem:[%s1902_s0 + $0xb8] sm:$0xff] }
   0x7   :  { %49 = vadd.xlane.f32.xlu0 %v48_v12  ;;  %v52_v23 = vadd.f32 %v51_v20, %v1011_v19  ;;  %v1050_v31 = vld [vmem:[%s1902_s0 + $0x70] sm:$0xff]  ;;  %v72_v34 = vadd.f32 %v71_v30, %v1043_v29  ;;  %v1065_v37 = vld [vmem:[%s1902_s0 + $0x98] sm:$0xff]  ;;  %v1070_v38 = vld [vmem:[%s1902_s0 + $0xa8] sm:$0xff]  ;;  %v91_v40 = vsel %vm46_vm0, %v1060_v36, 0.0 }
   0x8   :  { %v76_v35 = vadd.f32 %v75_v32, %v1050_v31  ;;  %v1075_v39 = vld [vmem:[%s1902_s0 + $0xb0] sm:$0xff]  ;;  %v83_v42 = vsel %vm46_vm0, %v1065_v37, 0.0  ;;  %v1089_v43 = vld [vmem:[%s1902_s0 + $0xa0] sm:$0xff]  ;;  %v87_v44 = vsel %vm46_vm0, %v1070_v38, 0.0  ;;  %v1099_v48 = vld [vmem:[%s1902_s0 + $0xe8] sm:$0xff] }
   0x9   :  { %v1082_v41 = vld [vmem:[%s1902_s0 + $0x90] sm:$0xff]  ;;  %v92_v45 = vadd.f32 %v91_v40, %v1075_v39  ;;  %v88_v47 = vadd.f32 %v87_v44, %v1089_v43  ;;  %v1104_v49 = vld [vmem:[%s1902_s0 + $0xc8] sm:$0xff]  ;;  %v1109_v50 = vld [vmem:[%s1902_s0 + $0xd8] sm:$0xff]  ;;  %v103_v52 = vsel %vm46_vm0, %v1099_v48, 0.0 }
   0xa   :  { %v84_v46 = vadd.f32 %v83_v42, %v1082_v41  ;;  %v1114_v51 = vld [vmem:[%s1902_s0 + $0xe0] sm:$0xff]  ;;  %v95_v54 = vsel %vm46_vm0, %v1104_v49, 0.0  ;;  %v1128_v55 = vld [vmem:[%s1902_s0 + $0xd0] sm:$0xff]  ;;  %v99_v56 = vsel %vm46_vm0, %v1109_v50, 0.0  ;;  %v1138_v60 = vld [vmem:[%s1902_s0 + $0xf8] sm:$0xff] }
   0xb   :  { %v1121_v53 = vld [vmem:[%s1902_s0 + $0xc0] sm:$0xff]  ;;  %v104_v57 = vadd.f32 %v103_v52, %v1114_v51  ;;  %v100_v59 = vadd.f32 %v99_v56, %v1128_v55  ;;  %v1143_v61 = vld [vmem:[%s1902_s0 + $0xf0] sm:$0xff]  ;;  %v107_v62 = vsel %vm46_vm0, %v1138_v60, 0.0 }
   0xc   :  { %v96_v58 = vadd.f32 %v95_v54, %v1121_v53  ;;  %v108_v63 = vadd.f32 %v107_v62, %v1143_v61 }
   0xd   :  { %69 = vadd.xlane.f32.xlu2 %v68_v21 }
   0xe   :  { %61 = vadd.xlane.f32.xlu1 %v60_v22 }
   0xf   :  { %53 = vadd.xlane.f32.xlu0 %v52_v23 }
  0x15   :  { %81 = vadd.xlane.f32.xlu2 %v80_v33 }
  0x16   :  { %77 = vadd.xlane.f32.xlu1 %v76_v35 }
  0x17   :  { %73 = vadd.xlane.f32.xlu0 %v72_v34 }
  0x1d   :  { %93 = vadd.xlane.f32.xlu2 %v92_v45 }
  0x1e   :  { %89 = vadd.xlane.f32.xlu1 %v88_v47 }
  0x1f   :  { %85 = vadd.xlane.f32.xlu0 %v84_v46 }
  0x25   :  { %105 = vadd.xlane.f32.xlu2 %v104_v57 }
  0x26   :  { %101 = vadd.xlane.f32.xlu1 %v100_v59 }
  0x27   :  { %97 = vadd.xlane.f32.xlu0 %v96_v58 }
  0x2f   :  { %109 = vadd.xlane.f32.xlu0 %v108_v63 }
  0x78   :  { %v66_v3 = vpop.xlane.xlu2 %65 }
  0x79   :  { %v58_v7 = vpop.xlane.xlu1 %57 }
  0x7a   :  { %v50_v8 = vpop.xlane.xlu0 %49  ;;  %v1148_v9 = vmul.f32 0.0069444445, %v58_v7 }
  0x7b   :  { %v1150_v11 = vmul.f32 0.0069444445, %v50_v8 }
  0x7c   :  { %v147_v12 = vsub.f32 %v953_v2, %v1148_v9  ;;  %v148_v16 = vsub.f32 %v960_v4, %v1148_v9 }
  0x7d   :  { %v143_v18 = vsub.f32 %v965_v5, %v1150_v11  ;;  %v144_v20 = vsub.f32 %v970_v6, %v1150_v11  ;;  %v1168_v6 = vmul.f32 0.0069444445, %v66_v3 }
  0x7e   :  { %v179_v21 = vmul.f32 %v147_v12, %v147_v12  ;;  %v180_v22 = vmul.f32 %v148_v16, %v148_v16 }
  0x7f   :  { %v175_v23 = vmul.f32 %v143_v18, %v143_v18  ;;  %v176_v28 = vmul.f32 %v144_v20, %v144_v20 }
  0x80   :  { %v70_v30 = vpop.xlane.xlu2 %69  ;;  %v215_v32 = vsel %vm46_vm0, %v180_v22, 0.0 }
  0x81   :  { %v207_v33 = vsel %vm46_vm0, %v176_v28, 0.0  ;;  %v1162_v34 = vmul.f32 0.0069444445, %v70_v30  ;;  %v62_v2 = vpop.xlane.xlu1 %61  ;;  %v216_v4 = vadd.f32 %v215_v32, %v179_v21  ;;  %v151_v21 = vsub.f32 %v943_v0, %v1168_v6 }
  0x82   :  { %v54_v35 = vpop.xlane.xlu0 %53  ;;  %v208_v40 = vadd.f32 %v207_v33, %v175_v23  ;;  %v1164_v42 = vmul.f32 0.0069444445, %v62_v2 }
  0x83   :  { %v1166_v5 = vmul.f32 0.0069444445, %v54_v35  ;;  %217 = vadd.xlane.f32.xlu0 %v216_v4  ;;  %v153_v44 = vsub.f32 %v997_v15, %v1162_v34  ;;  %v154_v45 = vsub.f32 %v980_v10, %v1162_v34  ;;  %v183_v2 = vmul.f32 %v151_v21, %v151_v21 }
  0x84   :  { %209 = vadd.xlane.f32.xlu1 %v208_v40  ;;  %v149_v46 = vsub.f32 %v1004_v17, %v1164_v42  ;;  %v150_v47 = vsub.f32 %v987_v13, %v1164_v42  ;;  %v152_v17 = vsub.f32 %v948_v1, %v1168_v6 }
  0x85   :  { %v145_v52 = vsub.f32 %v1011_v19, %v1166_v5  ;;  %v146_v54 = vsub.f32 %v992_v14, %v1166_v5  ;;  %v185_v56 = vmul.f32 %v153_v44, %v153_v44  ;;  %v186_v57 = vmul.f32 %v154_v45, %v154_v45 }
  0x86   :  { %v181_v58 = vmul.f32 %v149_v46, %v149_v46  ;;  %v182_v59 = vmul.f32 %v150_v47, %v150_v47  ;;  %v184_v23 = vmul.f32 %v152_v17, %v152_v17 }
  0x87   :  { %v177_v15 = vmul.f32 %v145_v52, %v145_v52  ;;  %v178_v62 = vmul.f32 %v146_v54, %v146_v54  ;;  %v227_v10 = vsel %vm46_vm0, %v186_v57, 0.0 }
  0x88   :  { %v82_v63 = vpop.xlane.xlu2 %81  ;;  %v228_v3 = vadd.f32 %v227_v10, %v185_v56  ;;  %v219_v13 = vsel %vm46_vm0, %v182_v59, 0.0 }
  0x89   :  { %v211_v19 = vsel %vm46_vm0, %v178_v62, 0.0  ;;  %v1187_v7 = vmul.f32 0.0069444445, %v82_v63  ;;  %v220_v8 = vadd.f32 %v219_v13, %v181_v58  ;;  %v78_v16 = vpop.xlane.xlu1 %77 }
  0x8a   :  { %v74_v14 = vpop.xlane.xlu0 %73  ;;  %v212_v12 = vadd.f32 %v211_v19, %v177_v15  ;;  %v1191_v20 = vmul.f32 0.0069444445, %v78_v16 }
  0x8b   :  { %v1189_v18 = vmul.f32 0.0069444445, %v74_v14  ;;  %229 = vadd.xlane.f32.xlu0 %v228_v3  ;;  %v159_v1 = vsub.f32 %v1036_v27, %v1187_v7  ;;  %v160_v22 = vsub.f32 %v1021_v24, %v1187_v7  ;;  %v223_v24 = vsel %vm46_vm0, %v184_v23, 0.0 }
  0x8c   :  { %221 = vadd.xlane.f32.xlu1 %v220_v8  ;;  %213 = vadd.xlane.f32.xlu2 %v212_v12  ;;  %v158_v0 = vsub.f32 %v1031_v26, %v1191_v20  ;;  %v224_v56 = vadd.f32 %v223_v24, %v183_v2 }
  0x8d   :  { %v155_v28 = vsub.f32 %v1043_v29, %v1189_v18  ;;  %v156_v30 = vsub.f32 %v1026_v25, %v1189_v18  ;;  %v191_v32 = vmul.f32 %v159_v1, %v159_v1  ;;  %v192_v33 = vmul.f32 %v160_v22, %v160_v22 }
  0x8e   :  { %v157_v29 = vsub.f32 %v1050_v31, %v1191_v20  ;;  %v190_v26 = vmul.f32 %v158_v0, %v158_v0 }
  0x8f   :  { %v187_v35 = vmul.f32 %v155_v28, %v155_v28  ;;  %v188_v4 = vmul.f32 %v156_v30, %v156_v30  ;;  %v239_v27 = vsel %vm46_vm0, %v192_v33, 0.0 }
  0x90   :  { %v94_v40 = vpop.xlane.xlu2 %93  ;;  %v240_v44 = vadd.f32 %v239_v27, %v191_v32  ;;  %v189_v31 = vmul.f32 %v157_v29, %v157_v29  ;;  %v235_v63 = vsel %vm46_vm0, %v190_v26, 0.0 }
  0x91   :  { %v231_v45 = vsel %vm46_vm0, %v188_v4, 0.0  ;;  %v1210_v25 = vmul.f32 0.0069444445, %v94_v40  ;;  %v90_v52 = vpop.xlane.xlu1 %89 }
  0x92   :  { %v86_v46 = vpop.xlane.xlu0 %85  ;;  %v232_v47 = vadd.f32 %v231_v45, %v187_v35  ;;  %v1214_v57 = vmul.f32 0.0069444445, %v90_v52  ;;  %v236_v8 = vadd.f32 %v235_v63, %v189_v31 }
  0x93   :  { %v1212_v54 = vmul.f32 0.0069444445, %v86_v46  ;;  %241 = vadd.xlane.f32.xlu0 %v240_v44  ;;  %v165_v58 = vsub.f32 %v1075_v39, %v1210_v25  ;;  %v166_v59 = vsub.f32 %v1060_v36, %v1210_v25 }
  0x94   :  { %233 = vadd.xlane.f32.xlu1 %v232_v47  ;;  %225 = vadd.xlane.f32.xlu2 %v224_v56  ;;  %v164_v3 = vsub.f32 %v1070_v38, %v1214_v57 }
  0x95   :  { %v161_v15 = vsub.f32 %v1082_v41, %v1212_v54  ;;  %v162_v62 = vsub.f32 %v1065_v37, %v1212_v54  ;;  %v197_v10 = vmul.f32 %v165_v58, %v165_v58  ;;  %v198_v17 = vmul.f32 %v166_v59, %v166_v59 }
  0x96   :  { %v163_v41 = vsub.f32 %v1089_v43, %v1214_v57  ;;  %v196_v22 = vmul.f32 %v164_v3, %v164_v3 }
  0x97   :  { %v193_v13 = vmul.f32 %v161_v15, %v161_v15  ;;  %v194_v39 = vmul.f32 %v162_v62, %v162_v62  ;;  %v251_v19 = vsel %vm46_vm0, %v198_v17, 0.0  ;;  %v919_v15 = vmov 0  }
  0x98   :  { %v106_v36 = vpop.xlane.xlu2 %105  ;;  %v252_v14 = vadd.f32 %v251_v19, %v197_v10  ;;  %v195_v43 = vmul.f32 %v163_v41, %v163_v41  ;;  %v247_v35 = vsel %vm46_vm0, %v196_v22, 0.0  ;;  %854 = vset.pattern.permute.xlu1 %v919_v15  ;;  %852 = vset.pattern.permute.xlu2 %v919_v15 }
  0x99   :  { %v243_v12 = vsel %vm46_vm0, %v194_v39, 0.0  ;;  %v1231_v37 = vmul.f32 0.0069444445, %v106_v36  ;;  %v102_v1 = vpop.xlane.xlu1 %101  ;;  %853 = vset.pattern.permute.xlu0 %v919_v15 }
  0x9a   :  { %v98_v16 = vpop.xlane.xlu0 %97  ;;  %v244_v21 = vadd.f32 %v243_v12, %v193_v13  ;;  %v1235_v38 = vmul.f32 0.0069444445, %v102_v1  ;;  %v248_v40 = vadd.f32 %v247_v35, %v195_v43 }
  0x9b   :  { %v1233_v23 = vmul.f32 0.0069444445, %v98_v16  ;;  %253 = vadd.xlane.f32.xlu0 %v252_v14  ;;  %v171_v28 = vsub.f32 %v1114_v51, %v1231_v37  ;;  %v172_v30 = vsub.f32 %v1099_v48, %v1231_v37 }
  0x9c   :  { %245 = vadd.xlane.f32.xlu1 %v244_v21  ;;  %237 = vadd.xlane.f32.xlu2 %v236_v8  ;;  %v170_v4 = vsub.f32 %v1109_v50, %v1235_v38 }
  0x9d   :  { %v167_v32 = vsub.f32 %v1121_v53, %v1233_v23  ;;  %v168_v33 = vsub.f32 %v1104_v49, %v1233_v23  ;;  %v203_v0 = vmul.f32 %v171_v28, %v171_v28  ;;  %v204_v2 = vmul.f32 %v172_v30, %v172_v30 }
  0x9e   :  { %v169_v53 = vsub.f32 %v1128_v55, %v1235_v38  ;;  %v202_v29 = vmul.f32 %v170_v4, %v170_v4 }
  0x9f   :  { %v199_v27 = vmul.f32 %v167_v32, %v167_v32  ;;  %v200_v51 = vmul.f32 %v168_v33, %v168_v33  ;;  %v263_v24 = vsel %vm46_vm0, %v204_v2, 0.0 }
  0xa0   :  { %v264_v48 = vadd.f32 %v263_v24, %v203_v0  ;;  %v201_v50 = vmul.f32 %v169_v53, %v169_v53  ;;  %v259_v26 = vsel %vm46_vm0, %v202_v29, 0.0 }
  0xa1   :  { %v255_v44 = vsel %vm46_vm0, %v200_v51, 0.0 }
  0xa2   :  { %v110_v45 = vpop.xlane.xlu0 %109  ;;  %v256_v49 = vadd.f32 %v255_v44, %v199_v27  ;;  %v260_v55 = vadd.f32 %v259_v26, %v201_v50 }
  0xa3   :  { %v1252_v46 = vmul.f32 0.0069444445, %v110_v45  ;;  %265 = vadd.xlane.f32.xlu0 %v264_v48 }
  0xa4   :  { %257 = vadd.xlane.f32.xlu1 %v256_v49  ;;  %249 = vadd.xlane.f32.xlu2 %v248_v40 }
  0xa5   :  { %v173_v47 = vsub.f32 %v1143_v61, %v1252_v46  ;;  %v174_v52 = vsub.f32 %v1138_v60, %v1252_v46 }
  0xa7   :  { %v205_v56 = vmul.f32 %v173_v47, %v173_v47  ;;  %v206_v58 = vmul.f32 %v174_v52, %v174_v52 }
  0xa9   :  { %v267_v59 = vsel %vm46_vm0, %v206_v58, 0.0 }
  0xaa   :  { %v268_v31 = vadd.f32 %v267_v59, %v205_v56  ;;  %v303_v56 = vld [vmem:[%s1903_s1] sm:$0xff] }
  0xac   :  { %269 = vadd.xlane.f32.xlu1 %v268_v31  ;;  %261 = vadd.xlane.f32.xlu2 %v260_v55 }
  0xf6   :  { %v218_v10 = vpop.xlane.xlu0 %217 }
  0xf7   :  { %v210_v62 = vpop.xlane.xlu1 %209  ;;  %v289_v17 = vmul.f32 0.0069444445, %v218_v10  ;;  %v305_v10 = vld [vmem:[%s1903_s1 + $0x10] sm:$0xff] }
  0xf8   :  { %v287_v61 = vmul.f32 0.0069444445, %v210_v62 }
  0xf9   :  { %v321_v60 = vadd.f32 0.001, %v289_v17 }
  0xfa   :  { %v319_v63 = vadd.f32 0.001, %v287_v61 }
  0xfb   :  { %vm361_vm3 = vweird.f32 %v321_v60 }
  0xfc   :  { %855 = vrsqrt.f32 %v319_v63  ;;  %vm341_vm2 = vweird.f32 %v319_v63 }
  0xfd   :  { %857 = vrsqrt.f32 %v321_v60 }
  0xfe   :  { %v230_v13 = vpop.xlane.xlu0 %229 }
  0xff   :  { %v222_v3 = vpop.xlane.xlu1 %221  ;;  %v214_v19 = vpop.xlane.xlu2 %213  ;;  %v292_v36 = vmul.f32 0.0069444445, %v230_v13 }
 0x100   :  { %v290_v39 = vmul.f32 0.0069444445, %v222_v3  ;;  %v288_v14 = vmul.f32 0.0069444445, %v214_v19 }
 0x101   :  { %v1262_v41 = vadd.f32 0.001, %v292_v36 }
 0x102   :  { %v856_v8 = vpop.eup %855  ;;  %v1260_v12 = vadd.f32 0.001, %v290_v39  ;;  %v1264_v1 = vadd.f32 0.001, %v288_v14 }
 0x103   :  { %v858_v16 = vpop.eup %857  ;;  %v336_v21 = vmul.f32 %v856_v8, %v319_v63  ;;  %vm342_vm1 = vweird.f32 %v856_v8  ;;  %vm391_vm12 = vweird.f32 %v1262_v41 }
 0x104   :  { %v356_v22 = vmul.f32 %v858_v16, %v321_v60  ;;  %859 = vrsqrt.f32 %v1260_v12  ;;  %vm362_vm4 = vweird.f32 %v858_v16  ;;  %vm343_vm5 = vmor %vm341_vm2, %vm342_vm1  ;;  %vm371_vm7 = vweird.f32 %v1260_v12 }
 0x105   :  { %v337_v28 = vmul.f32 %v856_v8, %v336_v21  ;;  %861 = vrsqrt.f32 %v1264_v1  ;;  %vm363_vm6 = vmor %vm361_vm3, %vm362_vm4  ;;  %vm351_vm9 = vweird.f32 %v1264_v1 }
 0x106   :  { %v357_v30 = vmul.f32 %v858_v16, %v356_v22  ;;  %863 = vrsqrt.f32 %v1262_v41  ;;  %v242_v33 = vpop.xlane.xlu0 %241 }
 0x107   :  { %v338_v43 = vmul.f32 0.5, %v337_v28  ;;  %v234_v32 = vpop.xlane.xlu1 %233  ;;  %v226_v2 = vpop.xlane.xlu2 %225  ;;  %v295_v4 = vmul.f32 0.0069444445, %v242_v33 }
 0x108   :  { %v358_v0 = vmul.f32 0.5, %v357_v30  ;;  %v293_v35 = vmul.f32 0.0069444445, %v234_v32  ;;  %v291_v51 = vmul.f32 0.0069444445, %v226_v2 }
 0x109   :  { %v339_v27 = vsub.f32 1.5, %v338_v43  ;;  %v1273_v40 = vadd.f32 0.001, %v295_v4 }
 0x10a   :  { %v1269_v24 = vpop.eup %859  ;;  %v1271_v48 = vadd.f32 0.001, %v293_v35  ;;  %v359_v53 = vsub.f32 1.5, %v358_v0  ;;  %v1279_v49 = vadd.f32 0.001, %v291_v51 }
 0x10b   :  { %v1275_v44 = vpop.eup %861  ;;  %v366_v45 = vmul.f32 %v1269_v24, %v1260_v12  ;;  %v340_v29 = vmul.f32 %v856_v8, %v339_v27  ;;  %vm372_vm8 = vweird.f32 %v1269_v24  ;;  %vm421_vm1 = vweird.f32 %v1273_v40 }
 0x10c   :  { %v1281_v50 = vpop.eup %863  ;;  %v346_v47 = vmul.f32 %v1275_v44, %v1264_v1  ;;  %865 = vrsqrt.f32 %v1271_v48  ;;  %v360_v61 = vmul.f32 %v858_v16, %v359_v53  ;;  %vm373_vm10 = vmor %vm371_vm7, %vm372_vm8  ;;  %vm352_vm11 = vweird.f32 %v1275_v44  ;;  %v308_v1 = vld [vmem:[%s1903_s1 + $0x28] sm:$0xff] }
 0x10d   :  { %v367_v52 = vmul.f32 %v1269_v24, %v366_v45  ;;  %v386_v26 = vmul.f32 %v1281_v50, %v1262_v41  ;;  %867 = vrsqrt.f32 %v1279_v49  ;;  %v344_v62 = vsel %vm343_vm5, %v856_v8, %v340_v29  ;;  %v306_v45 = vld [vmem:[%s1903_s1 + $0x18] sm:$0xff]  ;;  %vm1372_vm3 = vmor %vm351_vm9, %vm352_vm11 }
 0x10e   :  { %v347_v58 = vmul.f32 %v1275_v44, %v346_v47  ;;  %869 = vrsqrt.f32 %v1273_v40  ;;  %v254_v15 = vpop.xlane.xlu0 %253  ;;  %v1302_v13 = vmul.f32 %v344_v62, %v303_v56  ;;  %v364_v19 = vsel %vm363_vm6, %v858_v16, %v360_v61 }
 0x10f   :  { %v368_v55 = vmul.f32 0.5, %v367_v52  ;;  %v387_v59 = vmul.f32 %v1281_v50, %v386_v26  ;;  %v246_v31 = vpop.xlane.xlu1 %245  ;;  %v238_v17 = vpop.xlane.xlu2 %237  ;;  %v298_v3 = vmul.f32 0.0069444445, %v254_v15  ;;  %v1311_v21 = vmul.f32 %v364_v19, %v305_v10 }
 0x110   :  { %v296_v63 = vmul.f32 0.0069444445, %v246_v31  ;;  %v294_v39 = vmul.f32 0.0069444445, %v238_v17  ;;  %561 = vperm.xlu2 %852, %v1302_v13   ;;  %v348_v28 = vmul.f32 0.5, %v347_v58  ;;  %vm392_vm13 = vweird.f32 %v1281_v50 }
 0x111   :  { %v1308_v8 = vadd.f32 0.001, %v298_v3  ;;  %v369_v60 = vsub.f32 1.5, %v368_v55  ;;  %v388_v30 = vmul.f32 0.5, %v387_v59  ;;  %571 = vperm.xlu1 %854, %v1311_v21   ;;  %vm381_vm14 = vweird.f32 %v1279_v49  ;;  %vm393_vm4 = vmor %vm391_vm12, %vm392_vm13 }
 0x112   :  { %v1304_v36 = vpop.eup %865  ;;  %v1306_v14 = vadd.f32 0.001, %v296_v63  ;;  %v1315_v43 = vadd.f32 0.001, %v294_v39  ;;  %v349_v35 = vsub.f32 1.5, %v348_v28  ;;  %vm401_vm15 = vweird.f32 %v1271_v48 }
 0x113   :  { %v1313_v22 = vpop.eup %867  ;;  %v396_v33 = vmul.f32 %v1304_v36, %v1271_v48  ;;  %v389_v4 = vsub.f32 1.5, %v388_v30  ;;  %v370_v29 = vmul.f32 %v1269_v24, %v369_v60  ;;  %vm402_vm5 = vweird.f32 %v1304_v36 }
 0x114   :  { %v1317_v32 = vpop.eup %869  ;;  %v376_v16 = vmul.f32 %v1313_v22, %v1279_v49  ;;  %871 = vrsqrt.f32 %v1306_v14  ;;  %v350_v63 = vmul.f32 %v1275_v44, %v349_v35  ;;  %vm382_vm6 = vweird.f32 %v1313_v22  ;;  %vm1457_vm13 = vmor %vm401_vm15, %vm402_vm5 }
 0x115   :  { %v416_v0 = vmul.f32 %v1317_v32, %v1273_v40  ;;  %873 = vrsqrt.f32 %v1315_v43  ;;  %v397_v56 = vmul.f32 %v1304_v36, %v396_v33  ;;  %v374_v55 = vsel %vm373_vm10, %v1269_v24, %v370_v29  ;;  %vm383_vm11 = vmor %vm381_vm14, %vm382_vm6 }
 0x116   :  { %v377_v2 = vmul.f32 %v1313_v22, %v376_v16  ;;  %875 = vrsqrt.f32 %v1308_v8  ;;  %v266_v53 = vpop.xlane.xlu0 %265  ;;  %v1349_v62 = vmul.f32 %v374_v55, %v306_v45  ;;  %v390_v3 = vmul.f32 %v1281_v50, %v389_v4  ;;  %v304_v16 = vld [vmem:[%s1903_s1 + $0x8] sm:$0xff] }
 0x117   :  { %v417_v27 = vmul.f32 %v1317_v32, %v416_v0  ;;  %v258_v51 = vpop.xlane.xlu1 %257  ;;  %v250_v47 = vpop.xlane.xlu2 %249  ;;  %v301_v26 = vmul.f32 0.0069444445, %v266_v53  ;;  %vm422_vm2 = vweird.f32 %v1317_v32  ;;  %v398_v60 = vmul.f32 0.5, %v397_v56 }
 0x118   :  { %v299_v52 = vmul.f32 0.0069444445, %v258_v51  ;;  %v297_v58 = vmul.f32 0.0069444445, %v250_v47  ;;  %v378_v31 = vmul.f32 0.5, %v377_v2  ;;  %576 = vperm.xlu2 %852, %v1349_v62   ;;  %v354_v4 = vsel %vm1372_vm3, %v1275_v44, %v350_v63  ;;  %vm1416_vm7 = vmor %vm421_vm1, %vm422_vm2 }
 0x119   :  { %v418_v15 = vmul.f32 0.5, %v417_v27  ;;  %v1347_v12 = vadd.f32 0.001, %v301_v26  ;;  %v394_v27 = vsel %vm393_vm4, %v1281_v50, %v390_v3  ;;  %v1399_v41 = vmul.f32 %v354_v4, %v304_v16 }
 0x11a   :  { %v1345_v59 = vpop.eup %871  ;;  %v1353_v61 = vadd.f32 0.001, %v297_v58  ;;  %v1355_v17 = vadd.f32 0.001, %v299_v52  ;;  %v379_v33 = vsub.f32 1.5, %v378_v31  ;;  %v1401_v45 = vmul.f32 %v394_v27, %v308_v1 }
 0x11b   :  { %v1351_v10 = vpop.eup %873  ;;  %v426_v28 = vmul.f32 %v1345_v59, %v1306_v14  ;;  %v419_v0 = vsub.f32 1.5, %v418_v15  ;;  %v399_v58 = vsub.f32 1.5, %v398_v60  ;;  %566 = vperm.xlu0 %853, %v1399_v41   ;;  %vm411_vm8 = vweird.f32 %v1315_v43  ;;  %v307_v60 = vld [vmem:[%s1903_s1 + $0x20] sm:$0xff] }
 0x11c   :  { %v1359_v39 = vpop.eup %875  ;;  %v406_v24 = vmul.f32 %v1351_v10, %v1315_v43  ;;  %877 = vrsqrt.f32 %v1353_v61  ;;  %586 = vperm.xlu1 %854, %v1401_v45   ;;  %v380_v44 = vmul.f32 %v1313_v22, %v379_v33  ;;  %vm451_vm9 = vweird.f32 %v1308_v8 }
 0x11d   :  { %v446_v30 = vmul.f32 %v1359_v39, %v1308_v8  ;;  %879 = vrsqrt.f32 %v1347_v12  ;;  %v427_v52 = vmul.f32 %v1345_v59, %v426_v28  ;;  %v420_v50 = vmul.f32 %v1317_v32, %v419_v0  ;;  %v311_v28 = vld [vmem:[%s1903_s1 + $0x40] sm:$0xff] }
 0x11e   :  { %v407_v2 = vmul.f32 %v1351_v10, %v406_v24  ;;  %881 = vrsqrt.f32 %v1355_v17  ;;  %vm412_vm10 = vweird.f32 %v1351_v10  ;;  %vm452_vm12 = vweird.f32 %v1359_v39 }
 0x11f   :  { %v447_v35 = vmul.f32 %v1359_v39, %v446_v30  ;;  %v270_v51 = vpop.xlane.xlu1 %269  ;;  %v262_v29 = vpop.xlane.xlu2 %261  ;;  %v428_v16 = vmul.f32 0.5, %v427_v52  ;;  %v384_v0 = vsel %vm383_vm11, %v1313_v22, %v380_v44  ;;  %vm1469_vm14 = vmor %vm451_vm9, %vm452_vm12  ;;  %vm441_vm2 = vweird.f32 %v1353_v61 }
 0x120   :  { %v408_v53 = vmul.f32 0.5, %v407_v2  ;;  %v302_v47 = vmul.f32 0.0069444445, %v270_v51  ;;  %v300_v56 = vmul.f32 0.0069444445, %v262_v29  ;;  %v424_v2 = vsel %vm1416_vm7, %v1317_v32, %v420_v50  ;;  %vm413_vm15 = vmor %vm411_vm8, %vm412_vm10  ;;  %v314_v50 = vld [vmem:[%s1903_s1 + $0x58] sm:$0xff] }
 0x121   :  { %v448_v26 = vmul.f32 0.5, %v447_v35  ;;  %v400_v35 = vmul.f32 %v1304_v36, %v399_v58  ;;  %v1463_v27 = vmul.f32 %v384_v0, %v307_v60  ;;  %v1465_v22 = vmul.f32 %v424_v2, %v311_v28  ;;  %v317_v32 = vld [vmem:[%s1903_s1 + $0x70] sm:$0xff] }
 0x122   :  { %v1410_v55 = vpop.eup %877  ;;  %v1422_v15 = vadd.f32 0.001, %v300_v56  ;;  %v1424_v63 = vadd.f32 0.001, %v302_v47  ;;  %v409_v24 = vsub.f32 1.5, %v408_v53  ;;  %v310_v53 = vld [vmem:[%s1903_s1 + $0x38] sm:$0xff]  ;;  %vm481_vm3 = vweird.f32 %v1347_v12 }
 0x123   :  { %v1426_v3 = vpop.eup %879  ;;  %v449_v19 = vsub.f32 1.5, %v448_v26  ;;  %v436_v40 = vmul.f32 %v1410_v55, %v1353_v61  ;;  %581 = vperm.xlu2 %852, %v1463_v27   ;;  %601 = vperm.xlu0 %853, %v1465_v22   ;;  %vm442_vm1 = vweird.f32 %v1410_v55  ;;  %v429_v31 = vsub.f32 1.5, %v428_v16 }
 0x124   :  { %v1437_v30 = vpop.eup %881  ;;  %v476_v1 = vmul.f32 %v1426_v3, %v1347_v12  ;;  %883 = vrsqrt.f32 %v1422_v15  ;;  %v410_v29 = vmul.f32 %v1351_v10, %v409_v24  ;;  %vm482_vm4 = vweird.f32 %v1426_v3  ;;  %vm443_vm7 = vmor %vm441_vm2, %vm442_vm1  ;;  %v313_v12 = vld [vmem:[%s1903_s1 + $0x50] sm:$0xff] }
 0x125   :  { %v437_v33 = vmul.f32 %v1410_v55, %v436_v40  ;;  %885 = vrsqrt.f32 %v1424_v63  ;;  %v456_v48 = vmul.f32 %v1437_v30, %v1355_v17  ;;  %v450_v47 = vmul.f32 %v1359_v39, %v449_v19  ;;  %vm1524_vm8 = vmor %vm481_vm3, %vm482_vm4 }
 0x126   :  { %v477_v4 = vmul.f32 %v1426_v3, %v476_v1  ;;  %v414_v26 = vsel %vm413_vm15, %v1351_v10, %v410_v29  ;;  %v309_v10 = vld [vmem:[%s1903_s1 + $0x30] sm:$0xff]  ;;  %v404_v40 = vsel %vm1457_vm13, %v1304_v36, %v400_v35  ;;  %vm431_vm5 = vweird.f32 %v1306_v14  ;;  %v312_v29 = vld [vmem:[%s1903_s1 + $0x48] sm:$0xff] }
 0x127   :  { %v438_v51 = vmul.f32 0.5, %v437_v33  ;;  %v1488_v44 = vmul.f32 %v414_v26, %v310_v53  ;;  %v454_v43 = vsel %vm1469_vm14, %v1359_v39, %v450_v47  ;;  %v457_v24 = vmul.f32 %v1437_v30, %v456_v48 }
 0x128   :  { %v478_v8 = vmul.f32 0.5, %v477_v4  ;;  %vm432_vm6 = vweird.f32 %v1345_v59  ;;  %v1515_v28 = vmul.f32 %v454_v43, %v314_v50  ;;  %v1520_v61 = vmul.f32 %v404_v40, %v309_v10 }
 0x129   :  { %v439_v52 = vsub.f32 1.5, %v438_v51  ;;  %596 = vperm.xlu1 %854, %v1488_v44   ;;  %v458_v33 = vmul.f32 0.5, %v457_v24  ;;  %v430_v35 = vmul.f32 %v1345_v59, %v429_v31  ;;  %vm1531_vm9 = vmor %vm431_vm5, %vm432_vm6  ;;  %vm471_vm11 = vweird.f32 %v1422_v15 }
 0x12a   :  { %v884_v56 = vpop.eup %883  ;;  %v479_v58 = vsub.f32 1.5, %v478_v8  ;;  %vm461_vm13 = vweird.f32 %v1355_v17  ;;  %vm462_vm14 = vweird.f32 %v1437_v30  ;;  %v316_v8 = vld [vmem:[%s1903_s1 + $0x68] sm:$0xff]  ;;  %v315_v17 = vld [vmem:[%s1903_s1 + $0x60] sm:$0xff]  ;;  %v528_v24 = vmul.f32 %v1399_v41, %v1166_v5 }
 0x12b   :  { %v466_v19 = vmul.f32 %v884_v56, %v1422_v15  ;;  %v1504_v60 = vpop.eup %885  ;;  %v440_v39 = vmul.f32 %v1410_v55, %v439_v52  ;;  %591 = vperm.xlu2 %852, %v1520_v61   ;;  %vm472_vm10 = vweird.f32 %v884_v56  ;;  %616 = vperm.xlu0 %853, %v1515_v28   ;;  %v459_v48 = vsub.f32 1.5, %v458_v33  ;;  %vm463_vm15 = vmor %vm461_vm13, %vm462_vm14  ;;  %v511_v5 = vld [vmem:[%s1904_s2] sm:$0xff] }
 0x12c   :  { %v480_v1 = vmul.f32 %v1426_v3, %v479_v58  ;;  %v486_v2 = vmul.f32 %v1504_v60, %v1424_v63  ;;  %v434_v47 = vsel %vm1531_vm9, %v1345_v59, %v430_v35  ;;  %vm473_vm12 = vmor %vm471_vm11, %vm472_vm10  ;;  %vm491_vm1 = vweird.f32 %v1424_v63  ;;  %v318_v63 = vld [vmem:[%s1903_s1 + $0x78] sm:$0xff] }
 0x12d   :  { %v467_v36 = vmul.f32 %v884_v56, %v466_v19  ;;  %v444_v16 = vsel %vm443_vm7, %v1410_v55, %v440_v39  ;;  %v504_v26 = vmul.f32 %v434_v47, %v312_v29  ;;  %v460_v50 = vmul.f32 %v1437_v30, %v459_v48 }
 0x12e   :  { %v1536_v55 = vmul.f32 %v444_v16, %v313_v12  ;;  %v484_v51 = vsel %vm1524_vm8, %v1426_v3, %v480_v1  ;;  %v487_v53 = vmul.f32 %v1504_v60, %v486_v2  ;;  %vm492_vm2 = vweird.f32 %v1504_v60  ;;  %v514_v1 = vld [vmem:[%s1904_s2 + $0x18] sm:$0xff] }
 0x12f   :  { %v468_v0 = vmul.f32 0.5, %v467_v36  ;;  %v1556_v3 = vmul.f32 %v484_v51, %v317_v32  ;;  %v464_v31 = vsel %vm463_vm15, %v1437_v30, %v460_v50  ;;  %v527_v10 = vmul.f32 %v1302_v13, %v1150_v11  ;;  %vm493_vm3 = vmor %vm491_vm1, %vm492_vm2  ;;  %v515_v13 = vld [vmem:[%s1904_s2 + $0x20] sm:$0xff] }
 0x130   :  { %v488_v58 = vmul.f32 0.5, %v487_v53  ;;  %v507_v19 = vmul.f32 %v464_v31, %v315_v17  ;;  %v531_v11 = vmul.f32 %v1463_v27, %v1168_v6  ;;  %v530_v12 = vmul.f32 %v1349_v62, %v1164_v42  ;;  %v513_v27 = vld [vmem:[%s1904_s2 + $0x10] sm:$0xff]  ;;  %v518_v42 = vld [vmem:[%s1904_s2 + $0x38] sm:$0xff]  ;;  %v523_v53 = vld [vmem:[%s1904_s2 + $0x60] sm:$0xff] }
 0x131   :  { %v469_v4 = vsub.f32 1.5, %v468_v0  ;;  %611 = vperm.xlu1 %854, %v1536_v55   ;;  %v543_v41 = vsub.f32 %v511_v5, %v527_v10  ;;  %v534_v33 = vmul.f32 %v1488_v44, %v1191_v20  ;;  %v533_v14 = vmul.f32 %v1520_v61, %v1189_v18  ;;  %v516_v44 = vld [vmem:[%s1904_s2 + $0x28] sm:$0xff]  ;;  %v521_v18 = vld [vmem:[%s1904_s2 + $0x50] sm:$0xff]  ;;  %v887_v10 = vld [vmem:[%s1902_s0 + $0x20] sm:$0xff] }
 0x132   :  { %v489_v43 = vsub.f32 1.5, %v488_v58  ;;  %v547_v16 = vsub.f32 %v515_v13, %v531_v11  ;;  %v546_v6 = vsub.f32 %v514_v1, %v530_v12  ;;  %v532_v20 = vmul.f32 %v1401_v45, %v1162_v34  ;;  %v520_v34 = vld [vmem:[%s1904_s2 + $0x48] sm:$0xff] }
 0x133   :  { %v470_v15 = vmul.f32 %v884_v56, %v469_v4  ;;  %606 = vperm.xlu2 %852, %v504_v26   ;;  %631 = vperm.xlu0 %853, %v1556_v3   ;;  %v550_v0 = vsub.f32 %v518_v42, %v534_v33  ;;  %v537_v2 = vmul.f32 %v1536_v55, %v1214_v57  ;;  %v519_v57 = vld [vmem:[%s1904_s2 + $0x40] sm:$0xff]  ;;  %v892_v42 = vld [vmem:[%s1902_s0 + $0x18] sm:$0xff] }
 0x134   :  { %v490_v39 = vmul.f32 %v1504_v60, %v489_v43  ;;  %v548_v61 = vsub.f32 %v516_v44, %v532_v20  ;;  %v536_v35 = vmul.f32 %v504_v26, %v1212_v54  ;;  %v535_v4 = vmul.f32 %v1465_v22, %v1187_v7  ;;  %v524_v54 = vld [vmem:[%s1904_s2 + $0x68] sm:$0xff] }
 0x135   :  { %v474_v52 = vsel %vm473_vm12, %v884_v56, %v470_v15  ;;  %v512_v56 = vld [vmem:[%s1904_s2 + $0x8] sm:$0xff]  ;;  %v553_v49 = vsub.f32 %v521_v18, %v537_v2  ;;  %v539_v51 = vmul.f32 %v507_v19, %v1233_v23  ;;  %v538_v22 = vmul.f32 %v1515_v28, %v1210_v25  ;;  %v526_v23 = vld [vmem:[%s1904_s2 + $0x78] sm:$0xff]  ;;  %v525_v25 = vld [vmem:[%s1904_s2 + $0x70] sm:$0xff] }
 0x136   :  { %v508_v59 = vmul.f32 %v474_v52, %v316_v8  ;;  %v544_v40 = vsub.f32 %v512_v56, %v528_v24  ;;  %v494_v30 = vsel %vm493_vm3, %v1504_v60, %v490_v39  ;;  %v529_v60 = vmul.f32 %v1311_v21, %v1148_v9  ;;  %v517_v9 = vld [vmem:[%s1904_s2 + $0x30] sm:$0xff]  ;;  %v888_v39 = vld [vmem:[%s1902_s0 + $0x28] sm:$0xff]  ;;  %v893_v2 = vld [vmem:[%s1902_s0] sm:$0xff] }
 0x137   :  { %v510_v36 = vmul.f32 %v494_v30, %v318_v63  ;;  %v549_v21 = vsub.f32 %v517_v9, %v533_v14  ;;  %v552_v45 = vsub.f32 %v520_v34, %v536_v35  ;;  %v551_v32 = vsub.f32 %v519_v57, %v535_v4 }
 0x138   :  { %v545_v62 = vsub.f32 %v513_v27, %v529_v60  ;;  %v540_v55 = vmul.f32 %v508_v59, %v1235_v38  ;;  %v555_v7 = vsub.f32 %v523_v53, %v539_v51  ;;  %v522_v38 = vld [vmem:[%s1904_s2 + $0x58] sm:$0xff]  ;;  %v541_v8 = vmul.f32 %v1556_v3, %v1231_v37  ;;  %v891_v27 = vld [vmem:[%s1902_s0 + $0x10] sm:$0xff] }
 0x139   :  { %626 = vperm.xlu1 %854, %v508_v59   ;;  %v554_v29 = vsub.f32 %v522_v38, %v538_v22  ;;  %v542_v47 = vmul.f32 %v510_v36, %v1252_v46  ;;  %v890_v60 = vld [vmem:[%s1902_s0 + $0x58] sm:$0xff]  ;;  %v897_v38 = vld [vmem:[%s1902_s0 + $0x40] sm:$0xff] }
 0x13a   :  { %v556_v48 = vsub.f32 %v524_v54, %v540_v55  ;;  %v557_v28 = vsub.f32 %v525_v25, %v541_v8 }
 0x13b   :  { %621 = vperm.xlu2 %852, %v507_v19   ;;  %678 = vperm.xlu0 %853, %v544_v40   ;;  %v558_v15 = vsub.f32 %v526_v23, %v542_v47  ;;  %v898_v47 = vld [vmem:[%s1902_s0 + $0x48] sm:$0xff] }
 0x141   :  { %673 = vperm.xlu1 %854, %v543_v41  }
 0x143   :  { %636 = vperm.xlu2 %852, %v510_v36   ;;  %693 = vperm.xlu0 %853, %v547_v16   ;;  %v889_v16 = vld [vmem:[%s1902_s0 + $0x50] sm:$0xff] }
 0x149   :  { %688 = vperm.xlu1 %854, %v546_v6  }
 0x14b   :  { %683 = vperm.xlu2 %852, %v545_v62   ;;  %708 = vperm.xlu0 %853, %v550_v0  }
 0x151   :  { %703 = vperm.xlu1 %854, %v549_v21  }
 0x153   :  { %698 = vperm.xlu2 %852, %v548_v61   ;;  %723 = vperm.xlu0 %853, %v553_v49   ;;  %v894_v61 = vld [vmem:[%s1902_s0 + $0x8] sm:$0xff] }
 0x159   :  { %718 = vperm.xlu1 %854, %v552_v45  }
 0x15b   :  { %713 = vperm.xlu2 %852, %v551_v32   ;;  %738 = vperm.xlu0 %853, %v556_v48   ;;  %v895_v32 = vld [vmem:[%s1902_s0 + $0x80] sm:$0xff]  ;;  %v896_v48 = vld [vmem:[%s1902_s0 + $0x88] sm:$0xff] }
 0x161   :  { %733 = vperm.xlu1 %854, %v555_v7  }
 0x163   :  { %728 = vperm.xlu2 %852, %v554_v29  }
 0x169   :  { %748 = vperm.xlu1 %854, %v558_v15  }
 0x16a   :  { %v562_v52 = vpop.permute.xlu2 %561 }
 0x16b   :  { %743 = vperm.xlu2 %852, %v557_v28   ;;  %v639_v18 = vmul.f32 %v893_v2, %v562_v52  ;;  %v640_v35 = vmul.f32 %v894_v61, %v562_v52 }
 0x172   :  { %v1650_v26 = vpop.permute.xlu2 %576 }
 0x17d   :  { %v1652_v46 = vpop.permute.xlu2 %581 }
 0x17e   :  { %v647_v29 = vmul.f32 %v897_v38, %v1652_v46  ;;  %v648_v23 = vmul.f32 %v898_v47, %v1652_v46 }
 0x183   :  { %v572_v50 = vpop.permute.xlu1 %571 }
 0x184   :  { %v643_v40 = vmul.f32 %v887_v10, %v572_v50  ;;  %v644_v5 = vmul.f32 %v888_v39, %v572_v50  ;;  %v899_v50 = vld [vmem:[%s1902_s0 + $0x30] sm:$0xff] }
 0x185   :  { %v1654_v58 = vpop.permute.xlu2 %591 }
 0x18d   :  { %v1656_v59 = vpop.permute.xlu2 %606  ;;  %v567_v43 = vpop.permute.xlu0 %566 }
 0x18e   :  { %v587_v17 = vpop.permute.xlu1 %586  ;;  %v641_v33 = vmul.f32 %v891_v27, %v567_v43  ;;  %v642_v62 = vmul.f32 %v892_v42, %v567_v43  ;;  %v645_v43 = vmul.f32 %v899_v50, %v1650_v26 }
 0x18f   :  { %v649_v1 = vmul.f32 %v889_v16, %v587_v17  ;;  %v650_v6 = vmul.f32 %v890_v60, %v587_v17  ;;  %v900_v17 = vld [vmem:[%s1902_s0 + $0x38] sm:$0xff] }
 0x195   :  { %v1658_v37 = vpop.permute.xlu2 %621  ;;  %v602_v3 = vpop.permute.xlu0 %601 }
 0x196   :  { %v655_v51 = vmul.f32 %v895_v32, %v602_v3  ;;  %v656_v53 = vmul.f32 %v896_v48, %v602_v3  ;;  %v646_v3 = vmul.f32 %v900_v17, %v1650_v26  ;;  %v901_v26 = vld [vmem:[%s1902_s0 + $0xb0] sm:$0xff]  ;;  %v909_v48 = vld [vmem:[%s1902_s0 + $0xa0] sm:$0xff] }
 0x19b   :  { %v1660_v31 = vpop.permute.xlu1 %596 }
 0x19d   :  { %v1662_v24 = vpop.permute.xlu2 %636  ;;  %v1664_v56 = vpop.permute.xlu0 %616 }
 0x1a3   :  { %v1666_v19 = vpop.permute.xlu1 %611 }
 0x1a5   :  { %v684_v41 = vpop.permute.xlu2 %683  ;;  %v1674_v11 = vpop.permute.xlu0 %631 }
 0x1a6   :  { %v755_v63 = vadd.f32 %v684_v41, %v643_v40  ;;  %v756_v30 = vadd.f32 %v684_v41, %v644_v5 }
 0x1a8   :  { %v787_v13 = vmax.f32 %v755_v63, 0.0  ;;  %v788_v36 = vmax.f32 %v756_v30, 0.0 }
 0x1aa   :  { %819 = vst [vmem:[%s1905_s3 + $0x20] sm:$0xff] %v787_v13  ;;  %v661_v13 = vmul.f32 %v901_v26, %v1664_v56 }
 0x1ab   :  { %v1676_v12 = vpop.permute.xlu1 %626  ;;  %820 = vst.msk [vmem:[%s1905_s3 + $0x28] sm:$0xff] %vm46_vm0, %v788_v36  ;;  %v902_v36 = vld [vmem:[%s1902_s0 + $0xb8] sm:$0xff] }
 0x1ac   :  { %v662_v16 = vmul.f32 %v902_v36, %v1664_v56 }
 0x1ad   :  { %v699_v14 = vpop.permute.xlu2 %698  ;;  %v679_v21 = vpop.permute.xlu0 %678 }
 0x1ae   :  { %v761_v0 = vadd.f32 %v699_v14, %v649_v1  ;;  %v762_v9 = vadd.f32 %v699_v14, %v650_v6  ;;  %v753_v20 = vadd.f32 %v679_v21, %v641_v33  ;;  %v754_v44 = vadd.f32 %v679_v21, %v642_v62  ;;  %v903_v6 = vld [vmem:[%s1902_s0 + $0x70] sm:$0xff]  ;;  %v904_v33 = vld [vmem:[%s1902_s0 + $0x78] sm:$0xff]  ;;  %v905_v21 = vld [vmem:[%s1902_s0 + $0x60] sm:$0xff] }
 0x1af   :  { %v653_v27 = vmul.f32 %v903_v6, %v1660_v31  ;;  %v654_v42 = vmul.f32 %v904_v33, %v1660_v31 }
 0x1b0   :  { %v793_v49 = vmax.f32 %v761_v0, 0.0  ;;  %v794_v34 = vmax.f32 %v762_v9, 0.0  ;;  %v785_v45 = vmax.f32 %v753_v20, 0.0  ;;  %v786_v4 = vmax.f32 %v754_v44, 0.0  ;;  %v906_v44 = vld [vmem:[%s1902_s0 + $0x68] sm:$0xff] }
 0x1b1   :  { %v651_v20 = vmul.f32 %v905_v21, %v1654_v58  ;;  %v652_v2 = vmul.f32 %v906_v44, %v1654_v58  ;;  %v907_v58 = vld [vmem:[%s1902_s0 + $0xe0] sm:$0xff] }
 0x1b2   :  { %825 = vst [vmem:[%s1905_s3 + $0x50] sm:$0xff] %v793_v49 }
 0x1b3   :  { %v674_v57 = vpop.permute.xlu1 %673  ;;  %826 = vst.msk [vmem:[%s1905_s3 + $0x58] sm:$0xff] %vm46_vm0, %v794_v34 }
 0x1b4   :  { %v751_v55 = vadd.f32 %v674_v57, %v639_v18  ;;  %v752_v54 = vadd.f32 %v674_v57, %v640_v35  ;;  %817 = vst [vmem:[%s1905_s3 + $0x10] sm:$0xff] %v785_v45  ;;  %v667_v57 = vmul.f32 %v907_v58, %v1674_v11 }
 0x1b5   :  { %818 = vst.msk [vmem:[%s1905_s3 + $0x18] sm:$0xff] %vm46_vm0, %v786_v4  ;;  %v714_v15 = vpop.permute.xlu2 %713  ;;  %v694_v28 = vpop.permute.xlu0 %693 }
 0x1b6   :  { %v783_v7 = vmax.f32 %v751_v55, 0.0  ;;  %v784_v22 = vmax.f32 %v752_v54, 0.0  ;;  %v767_v8 = vadd.f32 %v714_v15, %v655_v51  ;;  %v768_v25 = vadd.f32 %v714_v15, %v656_v53  ;;  %v908_v55 = vld [vmem:[%s1902_s0 + $0xe8] sm:$0xff]  ;;  %v911_v15 = vld [vmem:[%s1902_s0 + $0x90] sm:$0xff] }
 0x1b7   :  { %v759_v52 = vadd.f32 %v694_v28, %v647_v29  ;;  %v760_v46 = vadd.f32 %v694_v28, %v648_v23  ;;  %v668_v54 = vmul.f32 %v908_v55, %v1674_v11  ;;  %v659_v53 = vmul.f32 %v909_v48, %v1666_v19 }
 0x1b8   :  { %815 = vst [vmem:[%s1905_s3] sm:$0xff] %v783_v7  ;;  %v799_v10 = vmax.f32 %v767_v8, 0.0  ;;  %v800_v40 = vmax.f32 %v768_v25, 0.0  ;;  %v910_v7 = vld [vmem:[%s1902_s0 + $0xa8] sm:$0xff]  ;;  %v657_v8 = vmul.f32 %v911_v15, %v1656_v59  ;;  %v912_v25 = vld [vmem:[%s1902_s0 + $0x98] sm:$0xff] }
 0x1b9   :  { %816 = vst.msk [vmem:[%s1905_s3 + $0x8] sm:$0xff] %vm46_vm0, %v784_v22  ;;  %v791_v39 = vmax.f32 %v759_v52, 0.0  ;;  %v792_v5 = vmax.f32 %v760_v46, 0.0  ;;  %v660_v22 = vmul.f32 %v910_v7, %v1666_v19  ;;  %v658_v28 = vmul.f32 %v912_v25, %v1656_v59 }
 0x1ba   :  { %831 = vst [vmem:[%s1905_s3 + $0x80] sm:$0xff] %v799_v10 }
 0x1bb   :  { %v689_v41 = vpop.permute.xlu1 %688  ;;  %832 = vst.msk [vmem:[%s1905_s3 + $0x88] sm:$0xff] %vm46_vm0, %v800_v40 }
 0x1bc   :  { %v757_v63 = vadd.f32 %v689_v41, %v645_v43  ;;  %v758_v30 = vadd.f32 %v689_v41, %v646_v3  ;;  %823 = vst [vmem:[%s1905_s3 + $0x40] sm:$0xff] %v791_v39  ;;  %v913_v39 = vld [vmem:[%s1902_s0 + $0xd0] sm:$0xff]  ;;  %v914_v41 = vld [vmem:[%s1902_s0 + $0xd8] sm:$0xff] }
 0x1bd   :  { %824 = vst.msk [vmem:[%s1905_s3 + $0x48] sm:$0xff] %vm46_vm0, %v792_v5  ;;  %v729_v56 = vpop.permute.xlu2 %728  ;;  %v709_v0 = vpop.permute.xlu0 %708  ;;  %v665_v5 = vmul.f32 %v913_v39, %v1676_v12 }
 0x1be   :  { %v789_v1 = vmax.f32 %v757_v63, 0.0  ;;  %v790_v60 = vmax.f32 %v758_v30, 0.0  ;;  %v773_v62 = vadd.f32 %v729_v56, %v661_v13  ;;  %v774_v14 = vadd.f32 %v729_v56, %v662_v16  ;;  %v916_v16 = vld [vmem:[%s1902_s0 + $0xc8] sm:$0xff] }
 0x1bf   :  { %v765_v9 = vadd.f32 %v709_v0, %v653_v27  ;;  %v766_v31 = vadd.f32 %v709_v0, %v654_v42  ;;  %v666_v63 = vmul.f32 %v914_v41, %v1676_v12  ;;  %v915_v12 = vld [vmem:[%s1902_s0 + $0xc0] sm:$0xff]  ;;  %v918_v0 = vld [vmem:[%s1902_s0 + $0xf8] sm:$0xff] }
 0x1c0   :  { %821 = vst [vmem:[%s1905_s3 + $0x30] sm:$0xff] %v789_v1  ;;  %v805_v18 = vmax.f32 %v773_v62, 0.0  ;;  %v806_v61 = vmax.f32 %v774_v14, 0.0  ;;  %v663_v36 = vmul.f32 %v915_v12, %v1658_v37  ;;  %v664_v1 = vmul.f32 %v916_v16, %v1658_v37  ;;  %v917_v37 = vld [vmem:[%s1902_s0 + $0xf0] sm:$0xff] }
 0x1c1   :  { %822 = vst.msk [vmem:[%s1905_s3 + $0x38] sm:$0xff] %vm46_vm0, %v790_v60  ;;  %v797_v35 = vmax.f32 %v765_v9, 0.0  ;;  %v798_v49 = vmax.f32 %v766_v31, 0.0  ;;  %v669_v14 = vmul.f32 %v917_v37, %v1662_v24  ;;  %v670_v9 = vmul.f32 %v918_v0, %v1662_v24 }
 0x1c2   :  { %837 = vst [vmem:[%s1905_s3 + $0xb0] sm:$0xff] %v805_v18 }
 0x1c3   :  { %v704_v34 = vpop.permute.xlu1 %703  ;;  %838 = vst.msk [vmem:[%s1905_s3 + $0xb8] sm:$0xff] %vm46_vm0, %v806_v61 }
 0x1c4   :  { %v763_v45 = vadd.f32 %v704_v34, %v651_v20  ;;  %v764_v4 = vadd.f32 %v704_v34, %v652_v2  ;;  %829 = vst [vmem:[%s1905_s3 + $0x70] sm:$0xff] %v797_v35 }
 0x1c5   :  { %830 = vst.msk [vmem:[%s1905_s3 + $0x78] sm:$0xff] %vm46_vm0, %v798_v49  ;;  %v744_v11 = vpop.permute.xlu2 %743  ;;  %v724_v47 = vpop.permute.xlu0 %723 }
 0x1c6   :  { %v795_v32 = vmax.f32 %v763_v45, 0.0  ;;  %v796_v51 = vmax.f32 %v764_v4, 0.0  ;;  %v779_v38 = vadd.f32 %v744_v11, %v667_v57  ;;  %v780_v29 = vadd.f32 %v744_v11, %v668_v54 }
 0x1c7   :  { %v771_v23 = vadd.f32 %v724_v47, %v659_v53  ;;  %v772_v19 = vadd.f32 %v724_v47, %v660_v22 }
 0x1c8   :  { %827 = vst [vmem:[%s1905_s3 + $0x60] sm:$0xff] %v795_v32  ;;  %v811_v52 = vmax.f32 %v779_v38, 0.0  ;;  %v812_v46 = vmax.f32 %v780_v29, 0.0 }
 0x1c9   :  { %828 = vst.msk [vmem:[%s1905_s3 + $0x68] sm:$0xff] %vm46_vm0, %v796_v51  ;;  %v803_v50 = vmax.f32 %v771_v23, 0.0  ;;  %v804_v43 = vmax.f32 %v772_v19, 0.0 }
 0x1ca   :  { %843 = vst [vmem:[%s1905_s3 + $0xe0] sm:$0xff] %v811_v52 }
 0x1cb   :  { %v719_v17 = vpop.permute.xlu1 %718  ;;  %844 = vst.msk [vmem:[%s1905_s3 + $0xe8] sm:$0xff] %vm46_vm0, %v812_v46 }
 0x1cc   :  { %v769_v3 = vadd.f32 %v719_v17, %v657_v8  ;;  %v770_v10 = vadd.f32 %v719_v17, %v658_v28  ;;  %835 = vst [vmem:[%s1905_s3 + $0xa0] sm:$0xff] %v803_v50 }
 0x1cd   :  { %836 = vst.msk [vmem:[%s1905_s3 + $0xa8] sm:$0xff] %vm46_vm0, %v804_v43  ;;  %v739_v30 = vpop.permute.xlu0 %738 }
 0x1ce   :  { %v801_v59 = vmax.f32 %v769_v3, 0.0  ;;  %v802_v40 = vmax.f32 %v770_v10, 0.0  ;;  %v777_v26 = vadd.f32 %v739_v30, %v665_v5  ;;  %v778_v13 = vadd.f32 %v739_v30, %v666_v63 }
 0x1d0   :  { %833 = vst [vmem:[%s1905_s3 + $0x90] sm:$0xff] %v801_v59  ;;  %v809_v60 = vmax.f32 %v777_v26, 0.0  ;;  %v810_v6 = vmax.f32 %v778_v13, 0.0 }
 0x1d1   :  { %834 = vst.msk [vmem:[%s1905_s3 + $0x98] sm:$0xff] %vm46_vm0, %v802_v40 }
 0x1d2   :  { %841 = vst [vmem:[%s1905_s3 + $0xd0] sm:$0xff] %v809_v60 }
 0x1d3   :  { %v734_v27 = vpop.permute.xlu1 %733  ;;  %842 = vst.msk [vmem:[%s1905_s3 + $0xd8] sm:$0xff] %vm46_vm0, %v810_v6 }
 0x1d4   :  { %v775_v33 = vadd.f32 %v734_v27, %v663_v36  ;;  %v776_v42 = vadd.f32 %v734_v27, %v664_v1 }
 0x1d6   :  { %v807_v56 = vmax.f32 %v775_v33, 0.0  ;;  %v808_v62 = vmax.f32 %v776_v42, 0.0 }
 0x1d8   :  { %839 = vst [vmem:[%s1905_s3 + $0xc0] sm:$0xff] %v807_v56 }
 0x1d9   :  { %840 = vst.msk [vmem:[%s1905_s3 + $0xc8] sm:$0xff] %vm46_vm0, %v808_v62 }
 0x1db   :  { %v749_v31 = vpop.permute.xlu1 %748 }
 0x1dc   :  { %v781_v21 = vadd.f32 %v749_v31, %v669_v14  ;;  %v782_v20 = vadd.f32 %v749_v31, %v670_v9 }
 0x1de   :  { %v813_v44 = vmax.f32 %v781_v21, 0.0  ;;  %v814_v2 = vmax.f32 %v782_v20, 0.0 }
 0x1e0   :  { %845 = vst [vmem:[%s1905_s3 + $0xf0] sm:$0xff] %v813_v44 }
 0x1e1   :  { %846 = vst.msk [vmem:[%s1905_s3 + $0xf8] sm:$0xff] %vm46_vm0, %v814_v2 }

</bundles_post_ra>
